<compile_context>
chip_gen: v7x
topology: tpu7x:2x2x1
jax: 0.10.0
libtpu: 0.0.40
codegen_flags: <defaults>
</compile_context>

<pallas_src>
import functools

import numpy as np
import jax
import jax.numpy as jnp
from jax.experimental import pallas as pl
from jax.experimental.pallas import tpu as pltpu

POST_ACT_STD = float(np.sqrt((1.0 - 1.0 / np.pi) / 2.0))  # get_post_activation_std(ReLU)
SWS_EPS = 1e-4
K_SINGLE_MAX = 2048          # single K block (no K grid axis) whenever K <= this
DIRECT_MAX_HW = 256          # direct conv kernel handles a whole H*W <= this per step


def _round_up(x, m):
    return ((x + m - 1) // m) * m


def _hw_budget():
    """(vmem_limit_bytes, TM_MAX) per TPU generation (v7x: 64 MiB physical VMEM)."""
    try:
        phys = int(getattr(pltpu.get_tpu_info(), "vmem_capacity_bytes", 0) or 0)
    except Exception:
        phys = 0
    if phys >= 100 * 1024 * 1024:          # v5e / v6e: 128 MiB physical
        return 96 * 1024 * 1024, 1024
    return 48 * 1024 * 1024, 512           # v7x-class (64 MiB) or unknown


VMEM_LIMIT_BYTES, TM_MAX = _hw_budget()

_PROBING = False   # set True during the eager probe pass in __main__
_DIRECT_OK = {}    # shape-signature -> whether the direct conv kernel lowered/ran


# ---------------------------------------------------------------------------
# GEMM kernels with fused bias / ReLU / residual epilogue
# ---------------------------------------------------------------------------

def _gemm_kernel_nk1(x_ref, w_ref, b_ref, *rest, relu_scale, add_skip):
    """Single-K-block GEMM: out = epilogue(x @ w + b); no scratch, no K loop."""
    if add_skip:
        skip_ref, o_ref = rest
    else:
        (o_ref,) = rest
        skip_ref = None
    out = jnp.dot(x_ref[...], w_ref[...], preferred_element_type=jnp.float32)
    out = out + b_ref[...]
    if relu_scale is not None:
        out = jnp.maximum(out, 0.0) * relu_scale
    if add_skip:
        out = out + skip_ref[...]
    o_ref[...] = out.astype(o_ref.dtype)


def _gemm_kernel_acc(x_ref, w_ref, b_ref, *rest, relu_scale, add_skip):
    """K-tiled fallback (only used when K > K_SINGLE_MAX): f32 scratch accumulator."""
    if add_skip:
        skip_ref, o_ref, acc_ref = rest
    else:
        o_ref, acc_ref = rest
        skip_ref = None

    @pl.when(pl.program_id(2) == 0)
    def _():
        acc_ref[...] = jnp.zeros_like(acc_ref)

    acc_ref[...] += jnp.dot(x_ref[...], w_ref[...],
                            preferred_element_type=jnp.float32)

    @pl.when(pl.program_id(2) == pl.num_programs(2) - 1)
    def _():
        out = acc_ref[...] + b_ref[...]
        if relu_scale is not None:
            out = jnp.maximum(out, 0.0) * relu_scale
        if add_skip:
            out = out + skip_ref[...]
        o_ref[...] = out.astype(o_ref.dtype)


def gemm_fused(x, wmat, bias, *, relu_scale=None, skip=None, out_dtype=jnp.float32):
    """out = epilogue(x @ wmat + bias) as a tiled Pallas GEMM.

    x:    (M, K) activations (any float; cast to bf16 for the MXU, K padded to wmat's K).
    wmat: (Kpad, Npad) bf16 pre-standardized / pre-folded weights, Npad % 128 == 0.
    bias: (1, Npad) f32.   skip: optional (M, Npad) f32 residual added in the epilogue.
    """
    m, kx = x.shape
    kp, npad = wmat.shape
    assert npad % 128 == 0 and kx <= kp

    tn = 256 if npad % 256 == 0 else 128       # 256-wide MXU on v6e/v7x; fine on v5e

    x = x.astype(jnp.bfloat16)
    if kx < kp:
        x = jnp.pad(x, ((0, 0), (0, kp - kx)))

    mp = _round_up(m, 16)                      # bf16 sublane packing
    tm = min(TM_MAX, mp)
    mp = _round_up(mp, tm)
    # Megacore (v7x): keep >=2 blocks along a parallel axis whenever possible.
    if mp // tm == 1 and npad // tn == 1 and mp >= 32:
        tm = _round_up(mp // 2, 16)
        mp = _round_up(_round_up(m, 16), tm)
    if mp != m:
        x = jnp.pad(x, ((0, mp - m), (0, 0)))

    add_skip = skip is not None
    if add_skip:
        s = skip.astype(jnp.float32)
        if mp != m:
            s = jnp.pad(s, ((0, mp - m), (0, 0)))

    cp = pltpu.CompilerParams(
        dimension_semantics=("parallel", "parallel"),
        vmem_limit_bytes=VMEM_LIMIT_BYTES)

    if kp <= K_SINGLE_MAX:
        inputs = [x, wmat, bias]
        in_specs = [
            pl.BlockSpec((tm, kp), lambda i, j: (i, 0)),
            pl.BlockSpec((kp, tn), lambda i, j: (0, j)),
            pl.BlockSpec((1, tn), lambda i, j: (0, j)),
        ]
        if add_skip:
            inputs.append(s)
            in_specs.append(pl.BlockSpec((tm, tn), lambda i, j: (i, j)))
        out = pl.pallas_call(
            functools.partial(_gemm_kernel_nk1, relu_scale=relu_scale,
                              add_skip=add_skip),
            out_shape=jax.ShapeDtypeStruct((mp, npad), out_dtype),
            grid=(mp // tm, npad // tn),
            in_specs=in_specs,
            out_specs=pl.BlockSpec((tm, tn), lambda i, j: (i, j)),
            compiler_params=cp,
        )(*inputs)
    else:
        tk = kp
        for cand in (512, 256, 128):
            if kp % cand == 0:
                tk = cand
                break
        nk = kp // tk
        inputs = [x, wmat, bias]
        in_specs = [
            pl.BlockSpec((tm, tk), lambda i, j, kk: (i, kk)),
            pl.BlockSpec((tk, tn), lambda i, j, kk: (kk, j)),
            pl.BlockSpec((1, tn), lambda i, j, kk: (0, j)),
        ]
        if add_skip:
            inputs.append(s)
            in_specs.append(pl.BlockSpec((tm, tn), lambda i, j, kk: (i, j)))
        out = pl.pallas_call(
            functools.partial(_gemm_kernel_acc, relu_scale=relu_scale,
                              add_skip=add_skip),
            out_shape=jax.ShapeDtypeStruct((mp, npad), out_dtype),
            grid=(mp // tm, npad // tn, nk),
            in_specs=in_specs,
            out_specs=pl.BlockSpec((tm, tn), lambda i, j, kk: (i, j)),
            scratch_shapes=[pltpu.VMEM((tm, tn), jnp.float32)],
            compiler_params=pltpu.CompilerParams(
                dimension_semantics=("parallel", "parallel", "arbitrary"),
                vmem_limit_bytes=VMEM_LIMIT_BYTES),
        )(*inputs)

    return out[:m] if mp != m else out


# ---------------------------------------------------------------------------
# Direct (implicit-im2col) stride-1 3x3 conv kernel
# ---------------------------------------------------------------------------

def _conv3x3_s1_kernel(x_ref, w_ref, b_ref, *rest, h, w, relu_scale, add_skip):
    """x_ref: (1, H+2, W+2, Cin) padded input, true channel count.
    w_ref: (9*Cin, TN) bf16, tap-major.  b_ref: (1, TN) f32.
    skip_ref (optional) / o_ref: (1, H*W, TN).  9 tap GEMMs accumulate in f32."""
    if add_skip:
        skip_ref, o_ref = rest
    else:
        (o_ref,) = rest
        skip_ref = None
    cin = x_ref.shape[3]
    tn = o_ref.shape[2]
    acc = jnp.zeros((h * w, tn), jnp.float32)
    for t in range(9):
        dh, dw = t // 3, t % 3
        win = x_ref[0, dh:dh + h, dw:dw + w, :].astype(jnp.float32)
        win = win.reshape(h * w, cin).astype(jnp.bfloat16)
        acc = acc + jnp.dot(win, w_ref[t * cin:(t + 1) * cin, :],
                            preferred_element_type=jnp.float32)
    out = acc + b_ref[...]
    if relu_scale is not None:
        out = jnp.maximum(out, 0.0) * relu_scale
    if add_skip:
        out = out + skip_ref[0]
    o_ref[0] = out.astype(o_ref.dtype)


def conv3x3_s1(x, cp, *, relu_scale=None, skip=None, out_dtype=jnp.float32):
    """Stride-1, padding-1 3x3 SWS conv. Tries the direct kernel, falls back to
    the im2col GEMM path (decision probed eagerly once per shape signature)."""
    n, hh, ww, _ = x.shape
    cin = cp["cin"]
    npad = cp["wmat"].shape[1]
    if (cp["ksize"] != (3, 3) or cp["wmat"].shape[0] != 9 * cin
            or hh * ww > DIRECT_MAX_HW):
        return conv_gemm(x, cp, stride=1, padding=1, relu_scale=relu_scale,
                         skip=skip, out_dtype=out_dtype)

    key = ("c3s1", n, hh, ww, cin, npad, skip is not None,
           relu_scale is not None, str(x.dtype), str(jnp.dtype(out_dtype)))

    def run_direct():
        xs = x[..., :cin] if x.shape[-1] != cin else x
        xp = jnp.pad(xs, ((0, 0), (1, 1), (1, 1), (0, 0)))
        tn = 256 if npad % 256 == 0 else 128
        add_skip = skip is not None
        inputs = [xp, cp["wmat"], cp["bias"]]
        in_specs = [
            pl.BlockSpec((1, hh + 2, ww + 2, cin), lambda i, j: (i, 0, 0, 0)),
            pl.BlockSpec((9 * cin, tn), lambda i, j: (0, j)),
            pl.BlockSpec((1, tn), lambda i, j: (0, j)),
        ]
        if add_skip:
            inputs.append(skip.astype(jnp.float32).reshape(n, hh * ww, npad))
            in_specs.append(pl.BlockSpec((1, hh * ww, tn), lambda i, j: (i, 0, j)))
        out = pl.pallas_call(
            functools.partial(_conv3x3_s1_kernel, h=hh, w=ww,
                              relu_scale=relu_scale, add_skip=add_skip),
            out_shape=jax.ShapeDtypeStruct((n, hh * ww, npad), out_dtype),
            grid=(n, npad // tn),
            in_specs=in_specs,
            out_specs=pl.BlockSpec((1, hh * ww, tn), lambda i, j: (i, 0, j)),
            compiler_params=pltpu.CompilerParams(
                dimension_semantics=("parallel", "parallel"),
                vmem_limit_bytes=VMEM_LIMIT_BYTES),
        )(*inputs)
        return out.reshape(n, hh, ww, npad)

    if _DIRECT_OK.get(key, True):
        if not _PROBING:
            return run_direct()
        try:
            out = run_direct()
            jax.block_until_ready(out)
            _DIRECT_OK[key] = True
            return out
        except Exception:
            _DIRECT_OK[key] = False
    return conv_gemm(x, cp, stride=1, padding=1, relu_scale=relu_scale,
                     skip=skip, out_dtype=out_dtype)


# ---------------------------------------------------------------------------
# Fused final ReLU/std + global mean + linear kernel (grid over batch)
# ---------------------------------------------------------------------------

def _pool_linear_kernel(x_ref, w_ref, b_ref, o_ref, *, inv_hw):
    i = pl.program_id(0)
    xa = jnp.maximum(x_ref[0], 0.0)                          # (HW, C)
    pooled = jnp.sum(xa, axis=0, keepdims=True) * inv_hw     # (1, C)
    row = jnp.dot(pooled.astype(w_ref.dtype), w_ref[...],
                  preferred_element_type=jnp.float32) + b_ref[...]
    o_ref[pl.ds(i, 1), :] = row


def pool_linear(x, wmat, bias):
    n, h, w, c = x.shape
    hw = h * w
    x3 = x.reshape(n, hw, c)
    ncp = wmat.shape[1]
    return pl.pallas_call(
        functools.partial(_pool_linear_kernel, inv_hw=1.0 / hw),
        out_shape=jax.ShapeDtypeStruct((n, ncp), jnp.float32),
        grid=(n,),
        in_specs=[pl.BlockSpec((1, hw, c), lambda i: (i, 0, 0)),
                  pl.BlockSpec((c, ncp), lambda i: (0, 0)),
                  pl.BlockSpec((1, ncp), lambda i: (0, 0))],
        out_specs=pl.BlockSpec((n, ncp), lambda i: (0, 0)),
        compiler_params=pltpu.CompilerParams(
            dimension_semantics=("arbitrary",),
            vmem_limit_bytes=VMEM_LIMIT_BYTES),
    )(x3, wmat, bias)


# ---------------------------------------------------------------------------
# im2col glue (used for stride-2 convs and as the fallback path)
# ---------------------------------------------------------------------------

def _im2col(x, kh, kw, stride, pad):
    if pad > 0:
        x = jnp.pad(x, ((0, 0), (pad, pad), (pad, pad), (0, 0)))
    n, hp, wp, c = x.shape
    oh = (hp - kh) // stride + 1
    ow = (wp - kw) // stride + 1
    cols = [x[:, i:i + stride * (oh - 1) + 1:stride,
              j:j + stride * (ow - 1) + 1:stride, :]
            for i in range(kh) for j in range(kw)]
    patches = jnp.concatenate(cols, axis=-1)
    return patches.reshape(n * oh * ow, kh * kw * c), n, oh, ow


def conv_gemm(x, cp, *, stride, padding, relu_scale=None, skip=None,
              out_dtype=jnp.float32):
    """SWS conv (weights pre-standardized / pre-folded) as im2col + fused GEMM."""
    kh, kw = cp["ksize"]
    cin = cp["cin"]
    xs = x[..., :cin] if x.shape[-1] != cin else x
    patches, n, oh, ow = _im2col(xs, kh, kw, stride, padding)
    npad = cp["wmat"].shape[1]
    skip_flat = None if skip is None else skip.reshape(n * oh * ow, npad)
    out = gemm_fused(patches, cp["wmat"], cp["bias"], relu_scale=relu_scale,
                     skip=skip_flat, out_dtype=out_dtype)
    return out.reshape(n, oh, ow, npad)


# ---------------------------------------------------------------------------
# Parameter preparation (weight standardization + scale folding, done once)
# ---------------------------------------------------------------------------

def _standardize_weight(w, gain, eps=SWS_EPS):
    # w: (Cout, Cin, KH, KW); torch.var is unbiased -> ddof=1
    fan_in = w.shape[1] * w.shape[2] * w.shape[3]
    mean = jnp.mean(w, axis=(1, 2, 3), keepdims=True)
    var = jnp.var(w, axis=(1, 2, 3), keepdims=True, ddof=1)
    w = (w - mean) / jnp.sqrt(var * fan_in + eps)
    if gain is not None:
        w = w * gain
    return w


def _pack_conv(w, b, *, in_scale=1.0, out_scale=1.0):
    """Fold scales; keep the TRUE cin on the K axis (pad K only to a 16 multiple);
    pad the output channels to a lane-dense 128 multiple; bf16 weights, f32 bias."""
    cout, cin, kh, kw = w.shape
    w = w * float(in_scale) * float(out_scale)
    b = b * float(out_scale)
    cout_pad = _round_up(cout, 128)
    k = kh * kw * cin
    kpad = _round_up(k, 16)
    wmat = jnp.transpose(w, (2, 3, 1, 0)).reshape(k, cout)   # tap-major, cin within
    wmat = jnp.pad(wmat, ((0, kpad - k), (0, cout_pad - cout)))
    bias = jnp.pad(b, (0, cout_pad - cout)).reshape(1, cout_pad).astype(jnp.float32)
    return {"wmat": wmat.astype(jnp.bfloat16), "bias": bias,
            "ksize": (kh, kw), "cin": cin}


def prepare_params(raw, num_classes, means=(0.0, 0.0, 0.0), stds=(1.0, 1.0, 1.0)):
    post = POST_ACT_STD
    prep = {"num_classes": num_classes,
            "in_mean": jnp.asarray(means, jnp.float32).reshape(1, 1, 1, 3),
            "in_std": jnp.asarray(stds, jnp.float32).reshape(1, 1, 1, 3)}

    w = _standardize_weight(raw["head"]["w"], raw["head"]["gain"])
    prep["head"] = _pack_conv(w, raw["head"]["b"])

    blocks = []
    for bp in raw["blocks"]:
        alpha, beta, ds = bp["alpha"], bp["beta"], bp["downscale"]
        pre = 1.0 / (beta * post)            # relu(x/beta)/post_std == relu(x)*pre
        w1 = _standardize_weight(bp["conv1"]["w"], bp["conv1"]["gain"])
        w2 = _standardize_weight(bp["conv2"]["w"], bp["conv2"]["gain"])
        e = {"downscale": ds,
             "conv1": _pack_conv(w1, bp["conv1"]["b"], in_scale=pre)}
        if bp["transition"] is None:
            out_scale2 = alpha * bp["skipinit_gain"]    # out = conv2*alpha*gain + x
            e["transition"] = None
        else:
            out_scale2 = alpha                          # out = conv2*alpha + trans
            wt = _standardize_weight(bp["transition"]["w"], bp["transition"]["gain"])
            e["transition"] = _pack_conv(wt, bp["transition"]["b"], in_scale=pre)
        # mid-block relu(h)/post_std: the 1/post_std folds into conv2's weight.
        e["conv2"] = _pack_conv(w2, bp["conv2"]["b"], in_scale=1.0 / post,
                                out_scale=out_scale2)
        blocks.append(e)
    prep["blocks"] = blocks

    # Final linear: fold the final 1/post_std; pad to lane-dense widths; keep f32.
    lw = raw["linear_wt"]                                # (C_last, num_classes)
    c_last = lw.shape[0]
    ncp = _round_up(num_classes, 128)
    lw = jnp.pad(lw / post, ((0, _round_up(c_last, 128) - c_last),
                             (0, ncp - num_classes)))
    lb = jnp.pad(raw["linear_b"], (0, ncp - num_classes)).reshape(1, ncp)
    prep["linear"] = {"wmat": lw.astype(jnp.float32), "bias": lb.astype(jnp.float32)}
    return prep


# ---------------------------------------------------------------------------
# NF-ResNetV2 forward
# ---------------------------------------------------------------------------

def nf_resnet_forward(x_nchw, prep):
    x = jnp.transpose(x_nchw, (0, 2, 3, 1)).astype(jnp.float32)   # NCHW -> NHWC
    x = (x - prep["in_mean"]) / prep["in_std"]                    # standardize()
    x = conv_gemm(x, prep["head"], stride=2, padding=1)           # f32 residual carrier

    for bp in prep["blocks"]:
        # Pre-activation relu(x/beta)/post_std == relu(x)*const; the constant is
        # folded into conv1/transition weights (XLA fuses this relu into the
        # slice/pad of the next conv's input).
        r = jnp.maximum(x, 0.0)
        if bp["transition"] is None:
            # regular_forward: skip is the raw block input x.
            h = conv3x3_s1(r, bp["conv1"], relu_scale=1.0, out_dtype=jnp.bfloat16)
            x = conv3x3_s1(h, bp["conv2"], skip=x)
        else:
            # transition_forward: skip is the pre-activated input.
            ds = bp["downscale"]
            rs = r[..., :bp["conv1"]["cin"]]
            h = conv_gemm(rs, bp["conv1"], stride=ds, padding=1,
                          relu_scale=1.0, out_dtype=jnp.bfloat16)
            n, hh, ww, c = rs.shape
            assert hh % ds == 0 and ww % ds == 0   # AvgPool2d(ds) reshape identity
            pooled = rs.reshape(n, hh // ds, ds, ww // ds, ds, c).mean(axis=(2, 4))
            t = gemm_fused(pooled.reshape(-1, c), bp["transition"]["wmat"],
                           bp["transition"]["bias"])
            x = conv3x3_s1(h, bp["conv2"],
                           skip=t.reshape(h.shape[0], h.shape[1], h.shape[2], -1))

    # TODO(synk): nn.Dropout(p=0.0) is identity in eval mode; intentionally omitted.
    logits = pool_linear(x, prep["linear"]["wmat"], prep["linear"]["bias"])
    return logits[:, :prep["num_classes"]]


# ---------------------------------------------------------------------------
# Deterministic raw parameter init (mirrors reset_parameters for ReLU)
# ---------------------------------------------------------------------------

def _init_sws_conv(key, cout, cin, kh, kw):
    fan_in = cin * kh * kw
    std = float(np.sqrt(2.0 / fan_in))          # kaiming_normal_, fan_in, relu
    w = std * jax.random.normal(key, (cout, cin, kh, kw), jnp.float32)
    return dict(w=w,
                b=jnp.zeros((cout,), jnp.float32),
                gain=jnp.ones((cout, 1, 1, 1), jnp.float32))


def build_params(key, num_classes, num_blocks, width_factor=1, alpha=0.2):
    num_channels = [16] + [2 ** (4 + i) * width_factor for i in range(len(num_blocks))]
    keys = jax.random.split(key, 256)
    kidx = iter(range(256))

    params = {"head": _init_sws_conv(keys[next(kidx)], num_channels[0], 3, 3, 3)}

    blocks = []
    expected_var = 1.0
    for g in range(1, len(num_blocks) + 1):
        specs = [(num_channels[g - 1], num_channels[g], float(np.sqrt(expected_var)))]
        expected_var = 1.0
        for _ in range(num_blocks[g - 1] - 1):
            specs.append((num_channels[g], num_channels[g], float(np.sqrt(expected_var))))
            expected_var += alpha ** 2
        for cin, cout, beta in specs:
            ds = cout // cin
            bp = dict(alpha=float(alpha), beta=beta,
                      conv1=_init_sws_conv(keys[next(kidx)], cout, cin, 3, 3),
                      conv2=_init_sws_conv(keys[next(kidx)], cout, cout, 3, 3),
                      skipinit_gain=0.0,                     # nn.Parameter(zeros(()))
                      downscale=ds,
                      transition=(_init_sws_conv(keys[next(kidx)], cout, cin, 1, 1)
                                  if cin != cout else None))
            blocks.append(bp)
    params["blocks"] = blocks

    c_last = num_channels[-1]
    lw = jax.random.normal(keys[next(kidx)], (num_classes, c_last), jnp.float32) \
        / float(np.sqrt(c_last))                              # kaiming, fan_in, linear
    params["linear_wt"] = lw.T                                # (C_last, num_classes)
    params["linear_b"] = jnp.zeros((num_classes,), jnp.float32)
    return params


if __name__ == "__main__":
    key = jax.random.PRNGKey(0)
    pkey, xkey = jax.random.split(key)

    # Small NF-ResNetV2: num_blocks=[2,2,2], width_factor=1 -> channels [16,16,32,64]
    raw_params = build_params(pkey, num_classes=10, num_blocks=[2, 2, 2],
                              width_factor=1, alpha=0.2)
    prep = prepare_params(raw_params, num_classes=10)

    x = jax.random.normal(xkey, (2, 3, 16, 16), jnp.float32)  # NCHW, like PyTorch

    # Pass 1 (eager): probes each direct stride-1 conv kernel per shape signature;
    # any config that fails to lower is recorded and routed through the im2col
    # GEMM fallback, so the script always runs.
    _PROBING = True
    out_probe = nf_resnet_forward(x, prep)
    jax.block_until_ready(out_probe)
    _PROBING = False

    # Pass 2: jitted forward with the recorded kernel choices.
    fwd = jax.jit(lambda xin: nf_resnet_forward(xin, prep))
    out = fwd(x)
    jax.block_until_ready(out)

    assert out.shape == (2, 10) and out.dtype == jnp.float32
    assert bool(jnp.all(jnp.isfinite(out)))
    print("KERNEL_OK")
</pallas_src>

<mosaic_0001>
module attributes {stable_mosaic.version = 11 : i64} {
  func.func @_gemm_kernel_nk1(%arg0: i32, %arg1: i32, %arg2: memref<64x32xbf16, #tpu.memory_space<vmem>>, %arg3: memref<32x128xbf16, #tpu.memory_space<vmem>>, %arg4: memref<1x128xf32, #tpu.memory_space<vmem>>, %arg5: memref<64x128xf32, #tpu.memory_space<vmem>>) attributes {dimension_semantics = [#tpu.dimension_semantics<parallel>, #tpu.dimension_semantics<parallel>], iteration_bounds = array<i64: 2, 1>, scalar_prefetch = 0 : i64, scratch_operands = 0 : i64, tpu.core_type = #tpu.core_type<tc>, window_params = [{transform_indices = @transform_0, window_bounds = array<i64: 64, 32>}, {transform_indices = @transform_1, window_bounds = array<i64: 32, 128>}, {transform_indices = @transform_2, window_bounds = array<i64: 1, 128>}, {transform_indices = @transform_3, window_bounds = array<i64: 64, 128>}]} {
    %c0 = arith.constant 0 : index
    %c0_0 = arith.constant 0 : index
    %0 = vector.load %arg2[%c0, %c0_0] : memref<64x32xbf16, #tpu.memory_space<vmem>>, vector<64x32xbf16>
    %c0_1 = arith.constant 0 : index
    %c0_2 = arith.constant 0 : index
    %1 = vector.load %arg3[%c0_1, %c0_2] : memref<32x128xbf16, #tpu.memory_space<vmem>>, vector<32x128xbf16>
    %cst = arith.constant dense<0.000000e+00> : vector<64x128xf32>
    %2 = tpu.matmul %0, %1, %cst {dimension_numbers = #tpu.dot_dimension_numbers<[1], [0], [0], [1], [0, 0, 1, 1], [], []>} : vector<64x32xbf16>, vector<32x128xbf16>, vector<64x128xf32> -> vector<64x128xf32>
    %c0_3 = arith.constant 0 : index
    %c0_4 = arith.constant 0 : index
    %3 = vector.load %arg4[%c0_3, %c0_4] : memref<1x128xf32, #tpu.memory_space<vmem>>, vector<1x128xf32>
    %4 = vector.broadcast %3 : vector<1x128xf32> to vector<64x128xf32>
    %5 = arith.addf %2, %4 : vector<64x128xf32>
    %c0_5 = arith.constant 0 : index
    %c0_6 = arith.constant 0 : index
    %6 = vector.load %arg5[%c0_5, %c0_6] : memref<64x128xf32, #tpu.memory_space<vmem>>, vector<64x128xf32>
    tpu.vector_store %arg5[%c0_5, %c0_6], %5 {strides = array<i32>} : memref<64x128xf32, #tpu.memory_space<vmem>>, vector<64x128xf32>,
    return
  }
  func.func @transform_0(%arg0: i32, %arg1: i32) -> (i32, i32) {
    %c0_i32 = arith.constant 0 : i32
    %c0_i32_0 = arith.constant 0 : i32
    return %arg0, %c0_i32 : i32, i32
  }
  func.func @transform_1(%arg0: i32, %arg1: i32) -> (i32, i32) {
    %c0_i32 = arith.constant 0 : i32
    %c0_i32_0 = arith.constant 0 : i32
    return %c0_i32, %arg1 : i32, i32
  }
  func.func @transform_2(%arg0: i32, %arg1: i32) -> (i32, i32) {
    %c0_i32 = arith.constant 0 : i32
    %c0_i32_0 = arith.constant 0 : i32
    return %c0_i32, %arg1 : i32, i32
  }
  func.func @transform_3(%arg0: i32, %arg1: i32) -> (i32, i32) {
    %c0_i32 = arith.constant 0 : i32
    return %arg0, %arg1 : i32, i32
  }
}

</mosaic_0001>

<bundles_post_ra>
// kernel: tpu_custom_call.1
= control target key start
LH: loop header
LB: loop body
LE: loop exit
PB: predicated region body
PF: predicated region fallthrough
CT: control target
= control target key end

     0   :  { %8 = vsyncpa [#allocation3], 0  ;;  %s811_s0 = inlined_call_operand.vmem [shape: bf16[128,32], index: 0, kind: input, shape index: {}]   ;;  %s812_s1 = inlined_call_operand.vmem [shape: bf16[32,128], index: 1, kind: input, shape index: {}]   ;;  %s813_s2 = inlined_call_operand.vmem [shape: f32[1,128], index: 2, kind: input, shape index: {}]   ;;  %s814_s3 = inlined_call_operand.hbm [shape: f32[128,128], index: 3, kind: output, shape index: {}]  }
   0x1   :  { %10 = vsyncpa [#allocation3 + $0x1], 0  ;;  %s684_s12 = smov 0   ;;  %s686_s13 = smov 0  }
   0x2   :  { %s688_s14 = smov 0   ;;  %s690_s15 = smov 0  }
   0x3   :  { %s692_s16 = smov 0   ;;  %s694_s17 = smov 0  }
   0x4 LB: > { %s469_s18 = sadd.s32 4294967295, %s659_s17   ;;  %s470_s19 = sadd.s32 4294967294, %s659_s17   ;;  %s659_s17 = sphi %s694_s17, %s16_s17   ;;  %s655_s16 = sphi %s692_s16, %s821_s16   ;;  %s651_s15 = sphi %s690_s15, %s820_s15   ;;  %s647_s14 = sphi %s688_s14, %s819_s14   ;;  %s643_s13 = sphi %s686_s13, %s818_s13   ;;  %s639_s12 = sphi %s684_s12, %s817_s12  }
   0x5   : > { %s28_s20 = sadd.s32 1, %s655_s16  ;;  %s115_s21 = sadd.s32 1, %s647_s14 }
   0x6   : > { %p30_p0 = scmp.ge.s32.totalorder %s28_s20, 2  ;;  %p125_p1 = scmp.ne.s32.totalorder %s647_s14, %s643_s13 }
   0x7   : > { %p126_p2 = scmp.eq.s32.totalorder %s469_s18, 1  ;;  %p131_p3 = scmp.ne.s32.totalorder %s643_s13, %s639_s12 }
   0x8   : > { %s823_s20 = smov (%p30_p0, %s28_s20), 0  ;;  %p132_p5 = scmp.eq.s32.totalorder %s470_s19, 1 }
   0x9   : > { %p724_p4 = por %p126_p2, %p125_p1  ;;  %s110_s23 = ssub.s32 %s655_s16, %s823_s20 }
   0xa   : > { %p475_p6 = scmp.ge.s32.totalorder %s659_s17, 1  ;;  %p113_p7 = scmp.eq.s32.totalorder %s110_s23, 0 }
   0xb   : > { %p731_p8 = por %p132_p5, %p131_p3  ;;  %p172_p9 = scmp.lt.s32.totalorder %s659_s17, 3 }
   0xc   : > { %s737_s25 = scalar_select %p113_p7, %s647_s14, %s115_s21  }
   0xd   : > { %p173_p10 = pnand %p475_p6, %p172_p9 }
   0xe   : > { %v575_v0 = vld [vmem:[%s812_s1] sm:$0xff] (!%p173_p10)   ;;  %s477_s28 = sshll.u32 (!%p173_p10), %s651_s15, 3  ;;  %v576_v1 = vld [vmem:[%s812_s1 + $0x8] sm:$0xff] (!%p173_p10)   ;;  %vm269_vm0 = vcmask (!%p173_p10), 261120   ;;  %s200_s8 = sand.u32 (!%p173_p10), 1, %s643_s13  }
   0xf   : > { %176 = sbr.rel (%p173_p10) target bundleno = 259 (0x103), region = 32  ;;  %p204_p11 = scmp.lt.s32.totalorder (!%p173_p10), %s477_s28, 15  ;;  %502 = vmatprep.subr.bf16.mxu0 (!%p173_p10), %v575_v0  ;;  %514 = vmatprep.subr.bf16.mxu1 (!%p173_p10), %v575_v0  ;;  %v479_v6 = vld [vmem:[%s813_s2] ss:$0 sm:$0xff] (!%p173_p10) }
  0x10   : > { %503 = vmatpush3.bf16.msra.mxu0 (!%p173_p10), %v575_v0  ;;  %516 = vmatpush3.bf16.msra.mxu1 (!%p173_p10), %v575_v0  ;;  %s476_s9 = sshll.u32 (!%p173_p10), %s200_s8, 6  ;;  %s495_s18 = sshll.u32 (!%p173_p10), %s651_s15, 10 }
  0x11   : > { %504 = vmatprep.subr.bf16.mxu0 (!%p173_p10), %v576_v1  ;;  %515 = vmatprep.subr.bf16.mxu1 (!%p173_p10), %v576_v1  ;;  %s202_s19 = scalar_lea.vmem (!%p173_p10), [#allocation2], %s476_s9  ;;  %s759_s26 = scalar_lea.hbm (!%p173_p10), %s814_s3, %s495_s18 }
  0x12   : > { %s370_s21 = sshll.u32 (!%p173_p10), %s202_s19, 4  ;;  %s765_s27 = scalar_lea.sflag (!%p173_p10), [#allocation3], %s200_s8  ;;  %s761_s21 = int_to_ptr.vmem [resolvable:$true] %s370_s21 }
  0x13   : > { %s661_s29 = smov (!%p173_p10), [#allocation2]  }
  0x14   : > { %505 = vmatpush3.bf16.msra.mxu0 (!%p173_p10), %v576_v1  ;;  %517 = vmatpush3.bf16.msra.mxu1 (!%p173_p10), %v576_v1  ;;  %s585_s30 = sshll.u32 (!%p173_p10), %s661_s29, 4  ;;  %s586_s30 = int_to_ptr.vmem [resolvable:$false] %s585_s30 }
  0x15   : > { %p588_p1 = scmp.lt.s32.totalorder (!%p173_p10), %s761_s21, %s586_s30 }
  0x16   : > { %s825_s28 = smov (!%p204_p11, %s477_s28), 15 }
  0x17   : > { %s478_s4 = sshll.u32 %s825_s28, 2  ;;  %s581_s28 = scalar_lea.vmem %s761_s21, 1024 }
  0x18   : > { %s207_s7 = scalar_lea.vmem %s811_s0, %s478_s4  ;;  %p582_p12 = scmp.ne.s32.totalorder %s761_s21, %s581_s28 }
  0x19   : > { %v577_v2 = vld [vmem:[%s207_s7] sm:$0xff]   ;;  %v578_v3 = vld [vmem:[%s207_s7 + $0x10] sm:$0xff]   ;;  %v579_v4 = vld [vmem:[%s207_s7 + $0x8] sm:$0xff]   ;;  %s587_s4 = scalar_lea.vmem %s586_s30, 2048 }
  0x1a   : > { %506 = vmatprep.mubr.msk.bf16.mxu0 %vm269_vm0, %v577_v2  ;;  %510 = vmatprep.mubr.msk.bf16.mxu1 %vm269_vm0, %v578_v3  ;;  %v580_v5 = vld [vmem:[%s207_s7 + $0x18] sm:$0xff]   ;;  %p583_p13 = pnand %p582_p12, %p724_p4  ;;  %p589_p2 = scmp.lt.s32.totalorder %s587_s4, %s581_s28 }
  0x1b   : > { %507 = vmatmul.mubr.msk.bf16.vlgmr.msra.gmra.mrb[0].mxu0 %vm269_vm0, %v579_v4  ;;  %511 = vmatmul.mubr.msk.bf16.vlgmr.msra.gmra.mrb[0].mxu1 %vm269_vm0, %v580_v5 }
  0x1c   : > { %p584_p0 = pneg %p583_p13  ;;  %p590_p3 = por %p589_p2, %p588_p1 }
  0x1e   : > { %p591_p5 = pnand %p590_p3, %p584_p0 }
  0xee   : > { %v508_v7 = vpop.f32.mrb[0].mxu0  ;;  %v512_v9 = vpop.f32.mrb[0].mxu1 }
  0xef   : > { %v325_v8 = vadd.f32 %v508_v7, %v479_v6  ;;  %v316_v10 = vpop.f32.mrb[1].mxu0  ;;  %v341_v11 = vadd.f32 %v512_v9, %v479_v6  ;;  %v332_v13 = vpop.f32.mrb[1].mxu1 }
  0xf0   : > { %v317_v12 = vadd.f32 %v479_v6, %v316_v10  ;;  %v509_v14 = vpop.f32.mrb[2].mxu0  ;;  %v333_v15 = vadd.f32 %v479_v6, %v332_v13  ;;  %v513_v17 = vpop.f32.mrb[2].mxu1 }
  0xf1   : > { %349 = vst [vmem:[%s202_s19 + $0x10] sm:$0xff] %v325_v8  ;;  %v328_v16 = vadd.f32 %v509_v14, %v479_v6  ;;  %v319_v18 = vpop.f32.mrb[3].mxu0  ;;  %353 = vst [vmem:[%s202_s19 + $0x30] sm:$0xff] %v341_v11  ;;  %v344_v19 = vadd.f32 %v513_v17, %v479_v6  ;;  %v335_v21 = vpop.f32.mrb[3].mxu1 }
  0xf2   : > { %347 = vst [vmem:[%s202_s19] sm:$0xff] %v317_v12  ;;  %v320_v20 = vadd.f32 %v479_v6, %v319_v18  ;;  %351 = vst [vmem:[%s202_s19 + $0x20] sm:$0xff] %v333_v15  ;;  %v336_v22 = vadd.f32 %v479_v6, %v335_v21 }
  0xf3   : > { %350 = vst [vmem:[%s202_s19 + $0x18] sm:$0xff] %v328_v16  ;;  %354 = vst [vmem:[%s202_s19 + $0x38] sm:$0xff] %v344_v19 }
  0xf4   : > { %348 = vst [vmem:[%s202_s19 + $0x8] sm:$0xff] %v320_v20  ;;  %352 = vst [vmem:[%s202_s19 + $0x28] sm:$0xff] %v336_v22 }
  0xf5   : > { %594 = shalt.err (!%p591_p5)
}
  0xf6   : > { %s595_s5 = scalar_lea.hbm %s759_s26, 1024  ;;  %s599_s8 = scalar_lea.hbm %s814_s3, 2048 }
  0xf7   : > { %p596_p6 = scmp.ne.s32.totalorder %s759_s26, %s595_s5  ;;  %p600_p10 = scmp.lt.u32.totalorder %s759_s26, %s814_s3 }
  0xf8   : > { %p601_p11 = scmp.lt.u32.totalorder %s599_s8, %s595_s5  ;;  %p603_p13 = scmp.lt.u32.totalorder %s595_s5, %s759_s26 }
  0xf9   : > { %p597_p7 = pnand %p596_p6, %p724_p4 }
  0xfa   : > { %p602_p12 = por %p601_p11, %p600_p10 }
  0xfb   : > { %p598_p9 = pneg %p597_p7 }
  0xfc   : > { %p604_p0 = por %p603_p13, %p602_p12 }
  0xfe   : > { %p605_p1 = pnand %p604_p0, %p598_p9 }
 0x100   : > { %608 = shalt.err (!%p605_p1)
}
 0x101   : > { %s662_s11 = smov 128   ;;  %s663_s18 = smov 8  }
 0x102   : > { %518 = dma.vmem_to_hbm [thread:$0]  (%p724_p4), %s761_s21, 1024, %s759_s26, %s765_s27, %s662_s11, %s662_s11, %s663_s18  }
 0x103 PF: > { %p524_p2 = scmp.ge.s32.totalorder %s659_s17, 2  ;;  %s385_s19 = sand.u32 1, %s639_s12  }
 0x104   : > { %s386_s23 = scalar_lea.sflag [#allocation3], %s385_s19 }
 0x105   : > { %p521_p3 = pnand %p524_p2, %p731_p8 }
 0x107   : > { %634 = dma.done.wait (!%p521_p3), %s386_s23, 1024  }
 0x108   : > { %636 = vsyncadd (!%p521_p3), %s386_s23, 4294966272  ;;  %s16_s17 = sadd.s32 1, %s659_s17   ;;  %s817_s12 = smov %s643_s13 }
 0x109   : > { %p13_p5 = scmp.ge.s32.totalorder %s16_s17, 4   ;;  %s818_s13 = smov %s647_s14 }
 0x10a   : > { %s819_s14 = smov %s737_s25  ;;  %s820_s15 = smov %s655_s16 }
 0x10b   : > { %s821_s16 = smov %s823_s20  ;;  %15 = sbr.rel (!%p13_p5) target bundleno = 4 (0x4), region = 73 }
 0x112   :  { %391 = vsyncpa [#allocation3], 1 }
 0x113   :  { %393 = vsyncpa [#allocation3 + $0x1], 1 }

</bundles_post_ra>
